<compile_context>
chip_gen: v7x
topology: tpu7x:2x2x1
jax: 0.10.0
libtpu: 0.0.40
codegen_flags: <defaults>
</compile_context>

<pallas_src>
import functools

import jax
import jax.numpy as jnp
from jax.experimental import pallas as pl
from jax.experimental.pallas import tpu as pltpu


# ---------------------------------------------------------------------------
# Kernel bodies
# ---------------------------------------------------------------------------

def _clamped_pow_spatial_sum(x_ref, p_ref, eps, p_static_int):
    """Sum over the spatial (sublane) axis of clamp(x, eps)^p for one (TN, THW, C) tile."""
    x = x_ref[...].astype(jnp.float32)
    xc = jnp.maximum(x, eps)                       # clamp(min=eps): strictly positive
    if p_static_int is not None:                   # static integer p: VPU-only pow
        xp = xc
        for _ in range(p_static_int - 1):
            xp = xp * xc
    else:                                          # runtime (trainable) p: exp/log on EUP
        xp = jnp.exp(p_ref[0] * jnp.log(xc))
    return jnp.sum(xp, axis=1)                     # (TN, C), lane-dense in C


def _finalize_pooled(acc_ref, p_ref, hw_total, p_static_int):
    """Mean over the full H*W then ^(1/p); acc holds the full spatial sum (f32, > 0)."""
    if p_static_int is not None:
        inv_p = 1.0 / float(p_static_int)
    else:
        inv_p = 1.0 / p_ref[0]
    pooled = acc_ref[...] * (1.0 / hw_total)
    return jnp.exp(jnp.log(pooled) * inv_p)        # tiny (TN, C): exp/log is fine here


def _global_head_fused_kernel(p_ref, x_ref, w_ref, b_ref, o_ref, acc_ref, *,
                              hw_total, eps, p_static_int):
    # p_ref: (1,) f32 SMEM | x_ref: (TN, THW, C) | w_ref: (C, NCp) resident
    # b_ref: (1, NCp) resident | o_ref: (TN, NCp) | acc_ref: (TN, C) f32 scratch
    k = pl.program_id(1)

    @pl.when(k == 0)
    def _():
        acc_ref[...] = jnp.zeros_like(acc_ref)

    acc_ref[...] += _clamped_pow_spatial_sum(x_ref, p_ref, eps, p_static_int)

    @pl.when(k == pl.num_programs(1) - 1)
    def _():
        pooled = _finalize_pooled(acc_ref, p_ref, hw_total, p_static_int)
        w = w_ref[...]                                        # (C, NCp): canonical (K, N)
        out = jnp.dot(pooled.astype(w.dtype), w,
                      preferred_element_type=jnp.float32)
        o_ref[...] = (out + b_ref[...].astype(jnp.float32)).astype(o_ref.dtype)


def _gem_pool_kernel(p_ref, x_ref, o_ref, acc_ref, *, hw_total, eps, p_static_int):
    # Pooling-only variant (FC done outside when the weight is too big for VMEM).
    k = pl.program_id(1)

    @pl.when(k == 0)
    def _():
        acc_ref[...] = jnp.zeros_like(acc_ref)

    acc_ref[...] += _clamped_pow_spatial_sum(x_ref, p_ref, eps, p_static_int)

    @pl.when(k == pl.num_programs(1) - 1)
    def _():
        o_ref[...] = _finalize_pooled(
            acc_ref, p_ref, hw_total, p_static_int).astype(o_ref.dtype)


# ---------------------------------------------------------------------------
# Wrapper-side sizing helpers
# ---------------------------------------------------------------------------

def _vmem_capacity_bytes():
    try:
        cap = getattr(pltpu.get_tpu_info(), "vmem_capacity_bytes", None)
        if cap:
            return int(cap)
    except Exception:
        pass
    return 64 * 1024 * 1024                        # conservative (v7x-class) fallback


def _pick_tiles(n, hw, c, itemsize, budget_bytes):
    """Pick (TN, THW).

    THW divides HW exactly (reduction axis: ragged blocks would corrupt the sum)
    and is either HW itself or a multiple of 8 (sublane alignment).  TN is N
    itself (when N <= 8) or a multiple of 8; when N >= 16 it is capped so the
    batch axis has >= 2 blocks ("parallel" can shard across TensorCores).
    """
    thw_cands = [hw] + [d for d in range((hw // 8) * 8, 0, -8) if hw % d == 0]

    if n <= 8:
        tn_cands = [n]
    else:
        cap = min(128, (n // 8) * 8)
        if n >= 16:
            cap = min(cap, max(8, (((n + 1) // 2) // 8) * 8))
        tn_cands = list(range(cap, 7, -8))

    for tn in tn_cands:
        for thw in thw_cands:
            if tn * thw * c * itemsize <= budget_bytes:
                return tn, thw
    return tn_cands[-1], thw_cands[-1]             # smallest tiles; vmem_limit decides


# ---------------------------------------------------------------------------
# Public entry point
# ---------------------------------------------------------------------------

def global_head(x, weight, bias, p=3.0, eps=1e-6, *, channels_last=False,
                max_fused_weight_bytes=None):
    """GlobalHead forward (GeM pooling to 1x1 + Linear).

    x:       (N, C, H, W) if channels_last=False (PyTorch layout), else (N, H, W, C).
    weight:  (nc, C)  -- PyTorch nn.Linear layout (not transposed).
    bias:    (nc,)
    p:       GeM exponent. A Python int/float with an integer value compiles a
             static VPU-only pow fast path; a jax scalar/array is treated as a
             runtime (trainable) value.
    Returns (N, nc) float32.
    """
    if channels_last:
        n, h, w, c = x.shape
        x_flat = x.reshape(n, h * w, c)            # already channel-lane-dense
    else:
        n, c, h, w = x.shape
        # One-time HBM transpose so C is the lane dim inside the kernel.
        # TODO(synk): feed NHWC activations (channels_last=True) to skip this pass.
        x_flat = jnp.transpose(x.reshape(n, c, h * w), (0, 2, 1))
    hw = h * w
    nc = weight.shape[0]

    # Static (integer) vs runtime GeM exponent.
    p_static_int = None
    if isinstance(p, (int, float)) and float(p).is_integer() and 1 <= int(p) <= 8:
        p_static_int = int(p)
    p_arr = jnp.asarray(p, dtype=jnp.float32).reshape(1)

    # Chip-aware VMEM budgets.
    vmem_cap = _vmem_capacity_bytes()
    if vmem_cap <= 64 * 1024 * 1024:               # v7x-class: 64 MiB per TensorCore
        tile_budget, vmem_limit = 6 * 1024 * 1024, 48 * 1024 * 1024
    else:                                          # v5e / v6e: 128 MiB
        tile_budget, vmem_limit = 16 * 1024 * 1024, 96 * 1024 * 1024

    tn, thw = _pick_tiles(n, hw, c, 4, tile_budget)          # budget in f32 bytes
    grid = (pl.cdiv(n, tn), hw // thw)

    nc_pad = pl.cdiv(nc, 128) * 128                          # lane-dense output stores
    w_itemsize = jnp.dtype(weight.dtype).itemsize
    if max_fused_weight_bytes is None:
        max_fused_weight_bytes = min(8 * 1024 * 1024, vmem_cap // 8)
    fuse_fc = 2 * c * nc_pad * w_itemsize <= max_fused_weight_bytes   # 2x: double buffer

    compiler_params = pltpu.CompilerParams(
        dimension_semantics=("parallel", "arbitrary"),
        vmem_limit_bytes=vmem_limit,
    )
    p_spec = pl.BlockSpec(memory_space=pltpu.MemorySpace.SMEM)
    x_spec = pl.BlockSpec((tn, thw, c), lambda i, k: (i, k, 0))

    if fuse_fc:
        # Pre-transpose the fc weight once (parameter-side, one-time cost) so the
        # in-kernel dot is a canonical (M,K)x(K,N) MXU feed with nc lane-dense.
        w_t = weight.T                                        # (C, nc)
        if nc_pad != nc:
            w_t = jnp.pad(w_t, ((0, 0), (0, nc_pad - nc)))
            b_p = jnp.pad(bias, ((0, nc_pad - nc),))
        else:
            b_p = bias
        b_p = b_p.reshape(1, nc_pad)

        kernel = functools.partial(_global_head_fused_kernel, hw_total=float(hw),
                                   eps=float(eps), p_static_int=p_static_int)
        out = pl.pallas_call(
            kernel,
            out_shape=jax.ShapeDtypeStruct((n, nc_pad), jnp.float32),
            grid_spec=pltpu.PrefetchScalarGridSpec(
                num_scalar_prefetch=0,
                grid=grid,
                in_specs=[
                    p_spec,                                           # GeM exponent (SMEM)
                    x_spec,                                           # pipelined x tiles
                    pl.BlockSpec((c, nc_pad), lambda i, k: (0, 0)),   # resident weight
                    pl.BlockSpec((1, nc_pad), lambda i, k: (0, 0)),   # resident bias
                ],
                out_specs=pl.BlockSpec((tn, nc_pad), lambda i, k: (i, 0)),
                scratch_shapes=[pltpu.VMEM((tn, c), jnp.float32)],
            ),
            compiler_params=compiler_params,
        )(p_arr, x_flat, w_t, b_p)
        return out[:, :nc]

    # Large-nc path: GeM pooling in Pallas; FC as a plain XLA matmul on the tiny
    # (N, C) pooled tensor (a resident (C, nc) weight would not fit VMEM).
    kernel = functools.partial(_gem_pool_kernel, hw_total=float(hw),
                               eps=float(eps), p_static_int=p_static_int)
    pooled = pl.pallas_call(
        kernel,
        out_shape=jax.ShapeDtypeStruct((n, c), jnp.float32),
        grid_spec=pltpu.PrefetchScalarGridSpec(
            num_scalar_prefetch=0,
            grid=grid,
            in_specs=[p_spec, x_spec],
            out_specs=pl.BlockSpec((tn, c), lambda i, k: (i, 0)),
            scratch_shapes=[pltpu.VMEM((tn, c), jnp.float32)],
        ),
        compiler_params=compiler_params,
    )(p_arr, x_flat)
    return pooled @ weight.T.astype(pooled.dtype) + bias.astype(pooled.dtype)


# ---------------------------------------------------------------------------
# Demo / self-check
# ---------------------------------------------------------------------------

if __name__ == "__main__":
    # Small shapes consistent with the module: batch=2, channels(w_in)=4,
    # spatial=16x16, num_classes(nc)=8, GeM p=3 (the module's default init).
    N, C, H, W, NC = 2, 4, 16, 16, 8
    P_VAL = 3.0
    EPS = 1e-6

    key = jax.random.PRNGKey(0)
    kx, kw, kb = jax.random.split(key, 3)
    x = jax.random.normal(kx, (N, C, H, W), dtype=jnp.float32)

    # Deterministic nn.Linear-style init: U(-1/sqrt(w_in), 1/sqrt(w_in)).
    bound = 1.0 / (C ** 0.5)
    weight = jax.random.uniform(kw, (NC, C), minval=-bound, maxval=bound,
                                dtype=jnp.float32)
    bias = jax.random.uniform(kb, (NC,), minval=-bound, maxval=bound,
                              dtype=jnp.float32)

    # Reference in plain JAX (same semantics as the PyTorch GlobalHead).
    xc = jnp.maximum(x, EPS)
    pooled_ref = jnp.mean(xc ** P_VAL, axis=(2, 3)) ** (1.0 / P_VAL)
    ref = pooled_ref @ weight.T + bias

    # 1) Fused FC, static integer p (VPU pow fast path).
    out = jax.block_until_ready(global_head(x, weight, bias, P_VAL, eps=EPS))
    assert out.shape == (N, NC)
    assert jnp.allclose(out, ref, atol=1e-3, rtol=1e-3), (
        float(jnp.max(jnp.abs(out - ref))))

    # 2) Split path (pooling-only kernel + XLA FC), runtime p (exp/log path).
    out_split = jax.block_until_ready(
        global_head(x, weight, bias, jnp.asarray(P_VAL, dtype=jnp.float32),
                    eps=EPS, max_fused_weight_bytes=0))
    assert jnp.allclose(out_split, ref, atol=1e-3, rtol=1e-3), (
        float(jnp.max(jnp.abs(out_split - ref))))

    # 3) channels_last input (no wrapper-side transpose of x).
    x_nhwc = jnp.transpose(x, (0, 2, 3, 1))
    out_cl = jax.block_until_ready(
        global_head(x_nhwc, weight, bias, P_VAL, eps=EPS, channels_last=True))
    assert jnp.allclose(out_cl, ref, atol=1e-3, rtol=1e-3), (
        float(jnp.max(jnp.abs(out_cl - ref))))

    print("KERNEL_OK")
</pallas_src>

<mosaic_0001>
module attributes {stable_mosaic.version = 11 : i64} {
  func.func @_global_head_fused_kernel(%arg0: i32, %arg1: i32, %arg2: memref<1xf32, #tpu.memory_space<smem>>, %arg3: memref<2x256x4xf32, #tpu.memory_space<vmem>>, %arg4: memref<4x128xf32, #tpu.memory_space<vmem>>, %arg5: memref<1x128xf32, #tpu.memory_space<vmem>>, %arg6: memref<2x128xf32, #tpu.memory_space<vmem>>, %arg7: memref<2x4xf32, #tpu.memory_space<vmem>>) attributes {dimension_semantics = [#tpu.dimension_semantics<parallel>, #tpu.dimension_semantics<arbitrary>], iteration_bounds = array<i64: 1, 1>, scalar_prefetch = 0 : i64, scratch_operands = 1 : i64, tpu.core_type = #tpu.core_type<tc>, window_params = [{transform_indices = @transform_0, window_bounds = array<i64: 1>}, {transform_indices = @transform_1, window_bounds = array<i64: 2, 256, 4>}, {pipeline_mode = #tpu.pipeline_mode<synchronous>, transform_indices = @transform_2, window_bounds = array<i64: 4, 128>}, {pipeline_mode = #tpu.pipeline_mode<synchronous>, transform_indices = @transform_3, window_bounds = array<i64: 1, 128>}, {transform_indices = @transform_4, window_bounds = array<i64: 2, 128>}]} {
    %c0_i32 = arith.constant 0 : i32
    %0 = arith.cmpi eq, %arg1, %c0_i32 : i32
    %1 = arith.extui %0 : i1 to i32
    %c0_i32_0 = arith.constant 0 : i32
    %2 = arith.cmpi ne, %1, %c0_i32_0 : i32
    scf.if %2 {
      %cst_10 = arith.constant 0.000000e+00 : f32
      %15 = vector.broadcast %cst_10 : f32 to vector<2x4xf32>
      %c0_11 = arith.constant 0 : index
      %c0_12 = arith.constant 0 : index
      %16 = vector.load %arg7[%c0_11, %c0_12] : memref<2x4xf32, #tpu.memory_space<vmem>>, vector<2x4xf32>
      tpu.vector_store %arg7[%c0_11, %c0_12], %15 {strides = array<i32>} : memref<2x4xf32, #tpu.memory_space<vmem>>, vector<2x4xf32>,
    } else {
    }
    %c0 = arith.constant 0 : index
    %c0_1 = arith.constant 0 : index
    %3 = vector.load %arg7[%c0, %c0_1] : memref<2x4xf32, #tpu.memory_space<vmem>>, vector<2x4xf32>
    %c0_2 = arith.constant 0 : index
    %c0_3 = arith.constant 0 : index
    %c0_4 = arith.constant 0 : index
    %4 = vector.load %arg3[%c0_2, %c0_3, %c0_4] : memref<2x256x4xf32, #tpu.memory_space<vmem>>, vector<2x256x4xf32>
    %cst = arith.constant 9.99999997E-7 : f32
    %5 = vector.broadcast %cst : f32 to vector<2x256x4xf32>
    %6 = arith.maximumf %4, %5 : vector<2x256x4xf32>
    %7 = arith.mulf %6, %6 : vector<2x256x4xf32>
    %8 = arith.mulf %7, %6 : vector<2x256x4xf32>
    %cst_5 = arith.constant dense<0.000000e+00> : vector<2x4xf32>
    %9 = vector.multi_reduction <add>, %8, %cst_5 [1] : vector<2x256x4xf32> to vector<2x4xf32>
    %10 = arith.addf %3, %9 : vector<2x4xf32>
    %c0_6 = arith.constant 0 : index
    %c0_7 = arith.constant 0 : index
    %11 = vector.load %arg7[%c0_6, %c0_7] : memref<2x4xf32, #tpu.memory_space<vmem>>, vector<2x4xf32>
    tpu.vector_store %arg7[%c0_6, %c0_7], %10 {strides = array<i32>} : memref<2x4xf32, #tpu.memory_space<vmem>>, vector<2x4xf32>,
    %c0_i32_8 = arith.constant 0 : i32
    %12 = arith.cmpi eq, %arg1, %c0_i32_8 : i32
    %13 = arith.extui %12 : i1 to i32
    %c0_i32_9 = arith.constant 0 : i32
    %14 = arith.cmpi ne, %13, %c0_i32_9 : i32
    scf.if %14 {
      %c0_10 = arith.constant 0 : index
      %c0_11 = arith.constant 0 : index
      %15 = vector.load %arg7[%c0_10, %c0_11] : memref<2x4xf32, #tpu.memory_space<vmem>>, vector<2x4xf32>
      %cst_12 = arith.constant 3.906250e-03 : f32
      %16 = vector.broadcast %cst_12 : f32 to vector<2x4xf32>
      %17 = arith.mulf %15, %16 : vector<2x4xf32>
      %18 = math.log %17 : vector<2x4xf32>
      %cst_13 = arith.constant 0.333333343 : f32
      %19 = vector.broadcast %cst_13 : f32 to vector<2x4xf32>
      %20 = arith.mulf %18, %19 : vector<2x4xf32>
      %21 = math.exp %20 : vector<2x4xf32>
      %c0_14 = arith.constant 0 : index
      %c0_15 = arith.constant 0 : index
      %22 = vector.load %arg4[%c0_14, %c0_15] : memref<4x128xf32, #tpu.memory_space<vmem>>, vector<4x128xf32>
      %cst_16 = arith.constant dense<0.000000e+00> : vector<2x128xf32>
      %23 = tpu.matmul %21, %22, %cst_16 {dimension_numbers = #tpu.dot_dimension_numbers<[1], [0], [0], [1], [0, 0, 1, 1], [], []>} : vector<2x4xf32>, vector<4x128xf32>, vector<2x128xf32> -> vector<2x128xf32>
      %c0_17 = arith.constant 0 : index
      %c0_18 = arith.constant 0 : index
      %24 = vector.load %arg5[%c0_17, %c0_18] : memref<1x128xf32, #tpu.memory_space<vmem>>, vector<1x128xf32>
      %25 = vector.broadcast %24 : vector<1x128xf32> to vector<2x128xf32>
      %26 = arith.addf %23, %25 : vector<2x128xf32>
      %c0_19 = arith.constant 0 : index
      %c0_20 = arith.constant 0 : index
      %27 = vector.load %arg6[%c0_19, %c0_20] : memref<2x128xf32, #tpu.memory_space<vmem>>, vector<2x128xf32>
      tpu.vector_store %arg6[%c0_19, %c0_20], %26 {strides = array<i32>} : memref<2x128xf32, #tpu.memory_space<vmem>>, vector<2x128xf32>,
    } else {
    }
    return
  }
  func.func @transform_0(%arg0: i32, %arg1: i32) -> i32 {
    %c0_i32 = arith.constant 0 : i32
    %c0_i32_0 = arith.constant 0 : i32
    return %c0_i32 : i32
  }
  func.func @transform_1(%arg0: i32, %arg1: i32) -> (i32, i32, i32) {
    %c0_i32 = arith.constant 0 : i32
    %c0_i32_0 = arith.constant 0 : i32
    return %arg0, %arg1, %c0_i32 : i32, i32, i32
  }
  func.func @transform_2(%arg0: i32, %arg1: i32) -> (i32, i32) {
    %c0_i32 = arith.constant 0 : i32
    %c0_i32_0 = arith.constant 0 : i32
    %c0_i32_1 = arith.constant 0 : i32
    return %c0_i32, %c0_i32_0 : i32, i32
  }
  func.func @transform_3(%arg0: i32, %arg1: i32) -> (i32, i32) {
    %c0_i32 = arith.constant 0 : i32
    %c0_i32_0 = arith.constant 0 : i32
    %c0_i32_1 = arith.constant 0 : i32
    return %c0_i32, %c0_i32_0 : i32, i32
  }
  func.func @transform_4(%arg0: i32, %arg1: i32) -> (i32, i32) {
    %c0_i32 = arith.constant 0 : i32
    %c0_i32_0 = arith.constant 0 : i32
    return %arg0, %c0_i32 : i32, i32
  }
}

</mosaic_0001>

<bundles_post_ra>
// kernel: tpu_custom_call.1
= control target key start
LH: loop header
LB: loop body
LE: loop exit
PB: predicated region body
PF: predicated region fallthrough
CT: control target
= control target key end

     0   :  { %vm23_vm0 = vcmask 25600   ;;  %v580_v0 = vmov 0.0   ;;  %vm282_vm1 = vcmask 31744   ;;  %s1050_s0 = inlined_call_operand.<no memory space> [shape: f32[1], index: 0, kind: input, shape index: {}]   ;;  %s1051_s1 = inlined_call_operand.vmem [shape: f32[2,256,4], index: 1, kind: input, shape index: {}]   ;;  %s1052_s2 = inlined_call_operand.vmem [shape: f32[4,128], index: 2, kind: input, shape index: {}]   ;;  %s1053_s3 = inlined_call_operand.vmem [shape: f32[1,128], index: 3, kind: input, shape index: {}]   ;;  %s1054_s4 = inlined_call_operand.hbm [shape: f32[2,128], index: 4, kind: output, shape index: {}]  }
   0x1   :  { %24 = vst.msk [vmem:[#allocation2] sm:$0x3] %vm23_vm0, %v580_v0  ;;  %544 = vmatprep.subr.mxu0 %v580_v0  ;;  %v26_v1 = vld [vmem:[%s1051_s1] sm:$0xff]  ;;  %v27_v2 = vld [vmem:[%s1051_s1 + $0x8] sm:$0xff]  ;;  %v28_v5 = vld [vmem:[%s1051_s1 + $0x10] sm:$0xff] }
   0x2   :  { %v90_v3 = vmax.f32 %v26_v1, 1e-06  ;;  %v91_v4 = vmax.f32 %v27_v2, 1e-06  ;;  %v92_v6 = vmax.f32 %v28_v5, 1e-06 }
   0x3   :  { %v29_v9 = vld [vmem:[%s1051_s1 + $0x18] sm:$0xff]  ;;  %v30_v10 = vld [vmem:[%s1051_s1 + $0x20] sm:$0xff]  ;;  %v31_v20 = vld [vmem:[%s1051_s1 + $0x28] sm:$0xff] }
   0x4   :  { %v154_v7 = vmul.f32 %v90_v3, %v90_v3  ;;  %v155_v8 = vmul.f32 %v91_v4, %v91_v4  ;;  %v93_v11 = vmax.f32 %v29_v9, 1e-06  ;;  %v156_v12 = vmul.f32 %v92_v6, %v92_v6  ;;  %v32_v22 = vld [vmem:[%s1051_s1 + $0x30] sm:$0xff]  ;;  %v33_v29 = vld [vmem:[%s1051_s1 + $0x38] sm:$0xff]  ;;  %v34_v30 = vld [vmem:[%s1051_s1 + $0x40] sm:$0xff] }
   0x5   :  { %v94_v15 = vmax.f32 %v30_v10, 1e-06  ;;  %v95_v23 = vmax.f32 %v31_v20, 1e-06  ;;  %v96_v27 = vmax.f32 %v32_v22, 1e-06 }
   0x6   :  { %v218_v13 = vmul.f32 %v154_v7, %v90_v3  ;;  %v219_v14 = vmul.f32 %v155_v8, %v91_v4  ;;  %v157_v16 = vmul.f32 %v93_v11, %v93_v11  ;;  %v220_v17 = vmul.f32 %v156_v12, %v92_v6  ;;  %v35_v34 = vld [vmem:[%s1051_s1 + $0x48] sm:$0xff]  ;;  %v36_v35 = vld [vmem:[%s1051_s1 + $0x50] sm:$0xff]  ;;  %v37_v36 = vld [vmem:[%s1051_s1 + $0x58] sm:$0xff] }
   0x7   :  { %v158_v24 = vmul.f32 %v94_v15, %v94_v15  ;;  %v159_v31 = vmul.f32 %v95_v23, %v95_v23  ;;  %v38_v37 = vld [vmem:[%s1051_s1 + $0x60] sm:$0xff]  ;;  %v39_v38 = vld [vmem:[%s1051_s1 + $0x68] sm:$0xff] }
   0x8   :  { %v283_v18 = vsel %vm282_vm1, %v218_v13, 0.0  ;;  %v284_v19 = vsel %vm282_vm1, %v219_v14, 0.0  ;;  %v221_v25 = vmul.f32 %v157_v16, %v93_v11  ;;  %v286_v26 = vsel %vm282_vm1, %v220_v17, 0.0 }
   0x9   :  { %v285_v21 = vadd.f32 %v284_v19, %v283_v18  ;;  %v222_v32 = vmul.f32 %v158_v24, %v94_v15 }
   0xa   :  { %v288_v33 = vsel %vm282_vm1, %v221_v25, 0.0 }
   0xb   :  { %v287_v28 = vadd.f32 %v286_v26, %v285_v21 }
   0xc   :  { %10 = vsyncpa [#allocation5], 0  ;;  %v40_v39 = vld [vmem:[%s1051_s1 + $0x70] sm:$0xff]  ;;  %v41_v40 = vld [vmem:[%s1051_s1 + $0x78] sm:$0xff]  ;;  %v97_v41 = vmax.f32 %v33_v29, 1e-06  ;;  %v160_v43 = vmul.f32 %v96_v27, %v96_v27  ;;  %v223_v47 = vmul.f32 %v159_v31, %v95_v23 }
   0xd   :  { %v98_v42 = vmax.f32 %v34_v30, 1e-06  ;;  %v289_v44 = vadd.f32 %v288_v33, %v287_v28  ;;  %v99_v45 = vmax.f32 %v35_v34, 1e-06  ;;  %v100_v46 = vmax.f32 %v36_v35, 1e-06 }
   0xe   :  { %v290_v48 = vsel %vm282_vm1, %v222_v32, 0.0  ;;  %v101_v49 = vmax.f32 %v37_v36, 1e-06  ;;  %v102_v50 = vmax.f32 %v38_v37, 1e-06  ;;  %v42_v52 = vld [vmem:[%s1051_s1 + $0x80] sm:$0xff]  ;;  %v161_v56 = vmul.f32 %v97_v41, %v97_v41 }
   0xf   :  { %v103_v51 = vmax.f32 %v39_v38, 1e-06  ;;  %v104_v53 = vmax.f32 %v40_v39, 1e-06  ;;  %v105_v54 = vmax.f32 %v41_v40, 1e-06  ;;  %v162_v57 = vmul.f32 %v98_v42, %v98_v42 }
  0x10   :  { %v43_v55 = vld [vmem:[%s1051_s1 + $0x88] sm:$0xff]  ;;  %v291_v58 = vadd.f32 %v290_v48, %v289_v44  ;;  %v163_v59 = vmul.f32 %v99_v45, %v99_v45  ;;  %v164_v60 = vmul.f32 %v100_v46, %v100_v46  ;;  %v224_v61 = vmul.f32 %v160_v43, %v96_v27  ;;  %v44_v63 = vld [vmem:[%s1051_s1 + $0x90] sm:$0xff]  ;;  %v45_v5 = vld [vmem:[%s1051_s1 + $0x98] sm:$0xff]  ;;  %s582_s9 = smov [#allocation4]  }
  0x11   :  { %v292_v62 = vsel %vm282_vm1, %v223_v47, 0.0  ;;  %v106_v1 = vmax.f32 %v42_v52, 1e-06  ;;  %v165_v2 = vmul.f32 %v101_v49, %v101_v49  ;;  %v166_v3 = vmul.f32 %v102_v50, %v102_v50  ;;  %v46_v9 = vld [vmem:[%s1051_s1 + $0xa0] sm:$0xff]  ;;  %v47_v10 = vld [vmem:[%s1051_s1 + $0xa8] sm:$0xff]  ;;  %v48_v11 = vld [vmem:[%s1051_s1 + $0xb0] sm:$0xff] }
  0x12   :  { %v167_v4 = vmul.f32 %v103_v51, %v103_v51  ;;  %v677_v6 = vmax.f32 %v43_v55, 1e-06  ;;  %v168_v7 = vmul.f32 %v104_v53, %v104_v53  ;;  %v169_v8 = vmul.f32 %v105_v54, %v105_v54  ;;  %v49_v15 = vld [vmem:[%s1051_s1 + $0xb8] sm:$0xff]  ;;  %v50_v16 = vld [vmem:[%s1051_s1 + $0xc0] sm:$0xff]  ;;  %v51_v17 = vld [vmem:[%s1051_s1 + $0xc8] sm:$0xff]  ;;  %s531_s10 = sshll.u32 %s582_s9, 4  ;;  %s532_s10 = int_to_ptr.vmem [resolvable:$true] %s531_s10 }
  0x13   :  { %v225_v12 = vmul.f32 %v161_v56, %v97_v41  ;;  %v226_v13 = vmul.f32 %v162_v57, %v98_v42  ;;  %v293_v14 = vadd.f32 %v292_v62, %v291_v58  ;;  %v697_v18 = vmax.f32 %v44_v63, 1e-06  ;;  %v52_v22 = vld [vmem:[%s1051_s1 + $0xd0] sm:$0xff]  ;;  %v53_v23 = vld [vmem:[%s1051_s1 + $0xd8] sm:$0xff]  ;;  %v54_v24 = vld [vmem:[%s1051_s1 + $0xe0] sm:$0xff]  ;;  %s556_s11 = scalar_lea.vmem %s532_s10, 32  ;;  %p561_p1 = scmp.lt.s32.totalorder %s532_s10, %s532_s10 }
  0x14   :  { %v699_v19 = vmul.f32 %v163_v59, %v99_v45  ;;  %v701_v20 = vmul.f32 %v164_v60, %v100_v46  ;;  %v294_v21 = vsel %vm282_vm1, %v224_v61, 0.0  ;;  %v58_v25 = vld [vmem:[%s1051_s1 + $0x100] sm:$0xff]  ;;  %v170_v26 = vmul.f32 %v106_v1, %v106_v1  ;;  %v55_v30 = vld [vmem:[%s1051_s1 + $0xe8] sm:$0xff]  ;;  %v56_v31 = vld [vmem:[%s1051_s1 + $0xf0] sm:$0xff]  ;;  %p557_p0 = scmp.ne.s32.totalorder %s532_s10, %s556_s11  ;;  %p562_p2 = scmp.lt.s32.totalorder %s556_s11, %s556_s11 }
  0x15   :  { %v716_v27 = vmul.f32 %v165_v2, %v101_v49  ;;  %v718_v28 = vmul.f32 %v166_v3, %v102_v50  ;;  %v720_v29 = vmul.f32 %v167_v4, %v103_v51  ;;  %v59_v32 = vld [vmem:[%s1051_s1 + $0x108] sm:$0xff]  ;;  %v60_v33 = vld [vmem:[%s1051_s1 + $0x110] sm:$0xff]  ;;  %v61_v34 = vld [vmem:[%s1051_s1 + $0x118] sm:$0xff]  ;;  %v737_v35 = vmax.f32 %v45_v5, 1e-06 }
  0x16   :  { %v741_v36 = vmul.f32 %v677_v6, %v677_v6  ;;  %v743_v37 = vmul.f32 %v168_v7, %v104_v53  ;;  %v745_v38 = vmul.f32 %v169_v8, %v105_v54  ;;  %v57_v39 = vld [vmem:[%s1051_s1 + $0xf8] sm:$0xff]  ;;  %v62_v40 = vld [vmem:[%s1051_s1 + $0x120] sm:$0xff]  ;;  %v753_v41 = vmax.f32 %v46_v9, 1e-06  ;;  %v63_v49 = vld [vmem:[%s1051_s1 + $0x128] sm:$0xff]  ;;  %p563_p3 = por %p562_p2, %p561_p1 }
  0x17   :  { %v755_v42 = vmax.f32 %v47_v10, 1e-06  ;;  %v757_v43 = vmax.f32 %v48_v11, 1e-06  ;;  %v295_v44 = vadd.f32 %v294_v21, %v293_v14  ;;  %v759_v45 = vmax.f32 %v49_v15, 1e-06 }
  0x18   :  { %v761_v46 = vmax.f32 %v50_v16, 1e-06  ;;  %v122_v47 = vmax.f32 %v58_v25, 1e-06  ;;  %v765_v48 = vmul.f32 %v697_v18, %v697_v18  ;;  %v770_v50 = vmax.f32 %v51_v17, 1e-06  ;;  %p564_p4 = pnand %p563_p3, %p557_p0 }
  0x19   :  { %v123_v51 = vmax.f32 %v59_v32, 1e-06  ;;  %v124_v52 = vmax.f32 %v60_v33, 1e-06  ;;  %v772_v53 = vmul.f32 %v170_v26, %v106_v1  ;;  %v774_v54 = vmax.f32 %v52_v22, 1e-06 }
  0x1a   :  { %v776_v55 = vmax.f32 %v53_v23, 1e-06  ;;  %v778_v56 = vmax.f32 %v54_v24, 1e-06  ;;  %v782_v57 = vmul.f32 %v737_v35, %v737_v35  ;;  %v784_v58 = vmax.f32 %v55_v30, 1e-06 }
  0x1b   :  { %v786_v59 = vmax.f32 %v56_v31, 1e-06  ;;  %v125_v60 = vmax.f32 %v61_v34, 1e-06  ;;  %v790_v61 = vmul.f32 %v753_v41, %v753_v41  ;;  %v64_v62 = vld [vmem:[%s1051_s1 + $0x130] sm:$0xff]  ;;  %v65_v63 = vld [vmem:[%s1051_s1 + $0x138] sm:$0xff]  ;;  %v802_v3 = vmul.f32 %v755_v42, %v755_v42 }
  0x1c   :  { %v798_v1 = vmax.f32 %v57_v39, 1e-06  ;;  %v126_v2 = vmax.f32 %v62_v40, 1e-06  ;;  %v186_v4 = vmul.f32 %v122_v47, %v122_v47  ;;  %v66_v5 = vld [vmem:[%s1051_s1 + $0x140] sm:$0xff]  ;;  %v187_v7 = vmul.f32 %v123_v51, %v123_v51  ;;  %v67_v11 = vld [vmem:[%s1051_s1 + $0x148] sm:$0xff] }
  0x1d   :  { %v188_v8 = vmul.f32 %v124_v52, %v124_v52  ;;  %v296_v9 = vsel %vm282_vm1, %v225_v12, 0.0  ;;  %v298_v10 = vsel %vm282_vm1, %v226_v13, 0.0  ;;  %v127_v14 = vmax.f32 %v63_v49, 1e-06  ;;  %v68_v12 = vld [vmem:[%s1051_s1 + $0x150] sm:$0xff]  ;;  %v69_v24 = vld [vmem:[%s1051_s1 + $0x158] sm:$0xff] }
  0x1e   :  { %v814_v15 = vmul.f32 %v757_v43, %v757_v43  ;;  %v818_v16 = vmul.f32 %v759_v45, %v759_v45  ;;  %v297_v17 = vadd.f32 %v296_v9, %v295_v44  ;;  %v128_v21 = vmax.f32 %v64_v62, 1e-06  ;;  %v70_v32 = vld [vmem:[%s1051_s1 + $0x160] sm:$0xff]  ;;  %v72_v9 = vld [vmem:[%s1051_s1 + $0x170] sm:$0xff] }
  0x1f   :  { %v129_v13 = vmax.f32 %v65_v63, 1e-06  ;;  %v189_v22 = vmul.f32 %v125_v60, %v125_v60  ;;  %v300_v23 = vsel %vm282_vm1, %v699_v19, 0.0  ;;  %v130_v25 = vmax.f32 %v66_v5, 1e-06 }
  0x20   :  { %v830_v26 = vmul.f32 %v761_v46, %v761_v46  ;;  %v250_v30 = vmul.f32 %v186_v4, %v122_v47  ;;  %v299_v31 = vadd.f32 %v298_v10, %v297_v17  ;;  %v190_v33 = vmul.f32 %v126_v2, %v126_v2  ;;  %v71_v47 = vld [vmem:[%s1051_s1 + $0x168] sm:$0xff]  ;;  %v73_v10 = vld [vmem:[%s1051_s1 + $0x178] sm:$0xff] }
  0x21   :  { %v251_v34 = vmul.f32 %v187_v7, %v123_v51  ;;  %v252_v39 = vmul.f32 %v188_v8, %v124_v52  ;;  %v302_v19 = vsel %vm282_vm1, %v701_v20, 0.0  ;;  %v131_v40 = vmax.f32 %v67_v11, 1e-06 }
  0x22   :  { %v837_v44 = vmax.f32 %v68_v12, 1e-06  ;;  %v841_v49 = vmul.f32 %v770_v50, %v770_v50  ;;  %v301_v62 = vadd.f32 %v300_v23, %v299_v31  ;;  %v846_v63 = vmax.f32 %v69_v24, 1e-06 }
  0x23   :  { %v191_v4 = vmul.f32 %v127_v14, %v127_v14  ;;  %v253_v51 = vmul.f32 %v189_v22, %v125_v60  ;;  %v304_v52 = vsel %vm282_vm1, %v716_v27, 0.0  ;;  %v850_v20 = vmax.f32 %v70_v32, 1e-06 }
  0x24   :  { %v192_v5 = vmul.f32 %v128_v21, %v128_v21  ;;  %v303_v7 = vadd.f32 %v302_v19, %v301_v62  ;;  %v352_v8 = vsel %vm282_vm1, %v250_v30, 0.0  ;;  %v254_v11 = vmul.f32 %v190_v33, %v126_v2 }
  0x25   :  { %v306_v60 = vsel %vm282_vm1, %v718_v28, 0.0  ;;  %v353_v27 = vsel %vm282_vm1, %v251_v34, 0.0  ;;  %v355_v17 = vsel %vm282_vm1, %v252_v39, 0.0  ;;  %v863_v12 = vmax.f32 %v71_v47, 1e-06 }
  0x26   :  { %v867_v22 = vmul.f32 %v774_v54, %v774_v54  ;;  %v305_v23 = vadd.f32 %v304_v52, %v303_v7  ;;  %v354_v24 = vadd.f32 %v353_v27, %v352_v8  ;;  %v193_v30 = vmul.f32 %v129_v13, %v129_v13  ;;  %v439_v27 = vld [vmem:[%s1052_s2] sm:$0xf] }
  0x27   :  { %v255_v31 = vmul.f32 %v191_v4, %v127_v14  ;;  %v308_v2 = vsel %vm282_vm1, %v720_v29, 0.0  ;;  %v357_v32 = vsel %vm282_vm1, %v253_v51, 0.0  ;;  %v872_v28 = vmax.f32 %v72_v9, 1e-06 }
  0x28   :  { %v874_v33 = vmax.f32 %v73_v10, 1e-06  ;;  %v307_v34 = vadd.f32 %v306_v60, %v305_v23  ;;  %v356_v39 = vadd.f32 %v355_v17, %v354_v24  ;;  %v194_v19 = vmul.f32 %v130_v25, %v130_v25  ;;  %v74_v60 = vld [vmem:[%s1051_s1 + $0x180] sm:$0xff] }
  0x29   :  { %v256_v62 = vmul.f32 %v192_v5, %v128_v21  ;;  %v310_v47 = vsel %vm282_vm1, %v743_v37, 0.0  ;;  %v359_v52 = vsel %vm282_vm1, %v254_v11, 0.0  ;;  %v881_v14 = vmul.f32 %v776_v55, %v776_v55 }
  0x2a   :  { %v195_v29 = vmul.f32 %v131_v40, %v131_v40  ;;  %v309_v4 = vadd.f32 %v308_v2, %v307_v34  ;;  %v358_v51 = vadd.f32 %v357_v32, %v356_v39  ;;  %v235_v7 = vmul.f32 %v741_v36, %v677_v6 }
  0x2b   :  { %v257_v8 = vmul.f32 %v193_v30, %v129_v13  ;;  %v312_v9 = vsel %vm282_vm1, %v745_v38, 0.0  ;;  %v361_v21 = vsel %vm282_vm1, %v255_v31, 0.0  ;;  %v196_v37 = vmul.f32 %v837_v44, %v837_v44 }
  0x2c   :  { %v197_v5 = vmul.f32 %v846_v63, %v846_v63  ;;  %v311_v10 = vadd.f32 %v310_v47, %v309_v4  ;;  %v360_v11 = vadd.f32 %v359_v52, %v358_v51  ;;  %v236_v6 = vmul.f32 %v765_v48, %v697_v18  ;;  %v75_v18 = vld [vmem:[%s1051_s1 + $0x188] sm:$0xff] }
  0x2d   :  { %v258_v36 = vmul.f32 %v194_v19, %v130_v25  ;;  %v314_v38 = vsel %vm282_vm1, %v772_v53, 0.0  ;;  %v363_v13 = vsel %vm282_vm1, %v256_v62, 0.0  ;;  %v237_v17 = vmul.f32 %v782_v57, %v737_v35  ;;  %v76_v35 = vld [vmem:[%s1051_s1 + $0x190] sm:$0xff] }
  0x2e   :  { %v259_v23 = vmul.f32 %v195_v29, %v131_v40  ;;  %v313_v24 = vadd.f32 %v312_v9, %v311_v10  ;;  %v362_v30 = vadd.f32 %v361_v21, %v360_v11  ;;  %v316_v48 = vsel %vm282_vm1, %v235_v7, 0.0  ;;  %v78_v11 = vld [vmem:[%s1051_s1 + $0x1a0] sm:$0xff] }
  0x2f   :  { %v365_v53 = vsel %vm282_vm1, %v257_v8, 0.0  ;;  %vm450_vm2 = vcmask 1043456   ;;  %v138_v25 = vmax.f32 %v74_v60, 1e-06  ;;  %v198_v31 = vmul.f32 %v850_v20, %v850_v20 }
  0x30   :  { %v315_v2 = vadd.f32 %v314_v38, %v313_v24  ;;  %v364_v32 = vadd.f32 %v363_v13, %v362_v30  ;;  %545 = vmatpush3.msk.msra.mxu0 %vm450_vm2, %v439_v27  ;;  %vm581_vm3 = vmmov 0   ;;  %v238_v57 = vmul.f32 %v790_v61, %v753_v41  ;;  %v79_v27 = vld [vmem:[%s1051_s1 + $0x1a8] sm:$0xff] }
  0x31   :  { %546 = vmatprep.mubr.msk.f32.mxu0 %vm581_vm3, %v580_v0  ;;  %v260_v40 = vmul.f32 %v196_v37, %v837_v44  ;;  %v318_v34 = vsel %vm282_vm1, %v236_v6, 0.0  ;;  %v367_v39 = vsel %vm282_vm1, %v258_v36, 0.0  ;;  %v139_v19 = vmax.f32 %v75_v18, 1e-06  ;;  %v77_v0 = vld [vmem:[%s1051_s1 + $0x198] sm:$0xff] }
  0x32   :  { %v199_v62 = vmul.f32 %v863_v12, %v863_v12  ;;  %v317_v47 = vadd.f32 %v316_v48, %v315_v2  ;;  %v366_v52 = vadd.f32 %v365_v53, %v364_v32  ;;  %v239_v29 = vmul.f32 %v802_v3, %v755_v42  ;;  %v80_v48 = vld [vmem:[%s1051_s1 + $0x1b0] sm:$0xff] }
  0x33   :  { %v261_v41 = vmul.f32 %v197_v5, %v846_v63  ;;  %v320_v61 = vsel %vm282_vm1, %v237_v17, 0.0  ;;  %v369_v44 = vsel %vm282_vm1, %v259_v23, 0.0  ;;  %v140_v4 = vmax.f32 %v76_v35, 1e-06 }
  0x34   :  { %v200_v51 = vmul.f32 %v872_v28, %v872_v28  ;;  %v319_v7 = vadd.f32 %v318_v34, %v317_v47  ;;  %v368_v8 = vadd.f32 %v367_v39, %v366_v52  ;;  %v240_v9 = vmul.f32 %v814_v15, %v757_v43  ;;  %v81_v47 = vld [vmem:[%s1051_s1 + $0x1b8] sm:$0xff]  ;;  %v82_v52 = vld [vmem:[%s1051_s1 + $0x1c0] sm:$0xff] }
  0x35   :  { %v262_v21 = vmul.f32 %v198_v31, %v850_v20  ;;  %v322_v37 = vsel %vm282_vm1, %v238_v57, 0.0  ;;  %v371_v42 = vsel %vm282_vm1, %v260_v40, 0.0  ;;  %v141_v3 = vmax.f32 %v77_v0, 1e-06 }
  0x36   :  { %v201_v63 = vmul.f32 %v874_v33, %v874_v33  ;;  %v321_v5 = vadd.f32 %v320_v61, %v319_v7  ;;  %v370_v10 = vadd.f32 %v369_v44, %v368_v8  ;;  %v241_v60 = vmul.f32 %v818_v16, %v759_v45 }
  0x37   :  { %v263_v43 = vmul.f32 %v199_v62, %v863_v12  ;;  %v324_v15 = vsel %vm282_vm1, %v239_v29, 0.0  ;;  %v373_v20 = vsel %vm282_vm1, %v261_v41, 0.0  ;;  %v182_v6 = vmul.f32 %v778_v56, %v778_v56 }
  0x38   :  { %v202_v36 = vmul.f32 %v138_v25, %v138_v25  ;;  %v323_v38 = vadd.f32 %v322_v37, %v321_v5  ;;  %v372_v13 = vadd.f32 %v371_v42, %v370_v10  ;;  %v242_v17 = vmul.f32 %v830_v26, %v761_v46  ;;  %v83_v37 = vld [vmem:[%s1051_s1 + $0x1c8] sm:$0xff] }
  0x39   :  { %v264_v45 = vmul.f32 %v200_v51, %v872_v28  ;;  %v326_v16 = vsel %vm282_vm1, %v240_v9, 0.0  ;;  %v375_v12 = vsel %vm282_vm1, %v262_v21, 0.0  ;;  %v142_v23 = vmax.f32 %v78_v11, 1e-06 }
  0x3a   :  { %v203_v24 = vmul.f32 %v139_v19, %v139_v19  ;;  %v325_v30 = vadd.f32 %v324_v15, %v323_v38  ;;  %v374_v18 = vadd.f32 %v373_v20, %v372_v13  ;;  %v243_v53 = vmul.f32 %v841_v49, %v770_v50 }
  0x3b   :  { %v265_v31 = vmul.f32 %v201_v63, %v874_v33  ;;  %v328_v46 = vsel %vm282_vm1, %v241_v60, 0.0  ;;  %v377_v26 = vsel %vm282_vm1, %v263_v43, 0.0  ;;  %v143_v28 = vmax.f32 %v79_v27, 1e-06 }
  0x3c   :  { %v204_v2 = vmul.f32 %v140_v4, %v140_v4  ;;  %v327_v32 = vadd.f32 %v326_v16, %v325_v30  ;;  %v376_v35 = vadd.f32 %v375_v12, %v374_v18  ;;  %v244_v57 = vmul.f32 %v867_v22, %v774_v54  ;;  %v85_v12 = vld [vmem:[%s1051_s1 + $0x1d8] sm:$0xff]  ;;  %v86_v18 = vld [vmem:[%s1051_s1 + $0x1e0] sm:$0xff] }
  0x3d   :  { %v266_v40 = vmul.f32 %v202_v36, %v138_v25  ;;  %v330_v34 = vsel %vm282_vm1, %v242_v17, 0.0  ;;  %v379_v39 = vsel %vm282_vm1, %v264_v45, 0.0  ;;  %v144_v62 = vmax.f32 %v80_v48, 1e-06 }
  0x3e   :  { %v205_v50 = vmul.f32 %v141_v3, %v141_v3  ;;  %v329_v49 = vadd.f32 %v328_v46, %v327_v32  ;;  %v378_v33 = vadd.f32 %v377_v26, %v376_v35  ;;  %v245_v54 = vmul.f32 %v881_v14, %v776_v55 }
  0x3f   :  { %v267_v22 = vmul.f32 %v203_v24, %v139_v19  ;;  %v332_v25 = vsel %vm282_vm1, %v243_v53, 0.0  ;;  %v381_v0 = vsel %vm282_vm1, %v265_v31, 0.0  ;;  %v183_v29 = vmul.f32 %v784_v58, %v784_v58 }
  0x40   :  { %v206_v41 = vmul.f32 %v142_v23, %v142_v23  ;;  %v331_v61 = vadd.f32 %v330_v34, %v329_v49  ;;  %v380_v44 = vadd.f32 %v379_v39, %v378_v33  ;;  %v246_v51 = vmul.f32 %v182_v6, %v778_v56  ;;  %v84_v56 = vld [vmem:[%s1051_s1 + $0x1d0] sm:$0xff] }
  0x41   :  { %v268_v7 = vmul.f32 %v204_v2, %v140_v4  ;;  %v334_v8 = vsel %vm282_vm1, %v244_v57, 0.0  ;;  %v383_v9 = vsel %vm282_vm1, %v266_v40, 0.0  ;;  %v145_v21 = vmax.f32 %v81_v47, 1e-06  ;;  %v87_v57 = vld [vmem:[%s1051_s1 + $0x1e8] sm:$0xff] }
  0x42   :  { %v146_v55 = vmax.f32 %v82_v52, 1e-06  ;;  %v333_v14 = vadd.f32 %v332_v25, %v331_v61  ;;  %v382_v19 = vadd.f32 %v381_v0, %v380_v44  ;;  %v207_v42 = vmul.f32 %v143_v28, %v143_v28 }
  0x43   :  { %v269_v63 = vmul.f32 %v205_v50, %v141_v3  ;;  %v336_v5 = vsel %vm282_vm1, %v245_v54, 0.0  ;;  %v385_v10 = vsel %vm282_vm1, %v267_v22, 0.0  ;;  %v184_v4 = vmul.f32 %v786_v59, %v786_v59 }
  0x44   :  { %v208_v11 = vmul.f32 %v144_v62, %v144_v62  ;;  %v335_v60 = vadd.f32 %v334_v8, %v333_v14  ;;  %v384_v43 = vadd.f32 %v383_v9, %v382_v19  ;;  %v247_v15 = vmul.f32 %v183_v29, %v784_v58  ;;  %v89_v29 = vld [vmem:[%s1051_s1 + $0x1f8] sm:$0xff] }
  0x45   :  { %v270_v20 = vmul.f32 %v206_v41, %v142_v23  ;;  %v338_v6 = vsel %vm282_vm1, %v246_v51, 0.0  ;;  %v387_v3 = vsel %vm282_vm1, %v268_v7, 0.0  ;;  %v147_v36 = vmax.f32 %v83_v37, 1e-06 }
  0x46   :  { %v337_v38 = vadd.f32 %v336_v5, %v335_v60  ;;  %v386_v13 = vadd.f32 %v385_v10, %v384_v43  ;;  %v148_v27 = vmax.f32 %v84_v56, 1e-06  ;;  %v209_v17 = vmul.f32 %v145_v21, %v145_v21 }
  0x47   :  { %v271_v45 = vmul.f32 %v207_v42, %v143_v28  ;;  %v389_v16 = vsel %vm282_vm1, %v269_v63, 0.0  ;;  %v185_v58 = vmul.f32 %v798_v1, %v798_v1  ;;  %v210_v23 = vmul.f32 %v146_v55, %v146_v55 }
  0x48   :  { %v339_v24 = vadd.f32 %v338_v6, %v337_v38  ;;  %v388_v30 = vadd.f32 %v387_v3, %v386_v13  ;;  %v248_v48 = vmul.f32 %v184_v4, %v786_v59  ;;  %v272_v53 = vmul.f32 %v208_v11, %v144_v62  ;;  %v88_v59 = vld [vmem:[%s1051_s1 + $0x1f0] sm:$0xff] }
  0x49   :  { %v340_v31 = vsel %vm282_vm1, %v247_v15, 0.0  ;;  %v391_v46 = vsel %vm282_vm1, %v270_v20, 0.0  ;;  %v149_v28 = vmax.f32 %v85_v12, 1e-06  ;;  %v211_v2 = vmul.f32 %v147_v36, %v147_v36 }
  0x4a   :  { %v390_v26 = vadd.f32 %v389_v16, %v388_v30  ;;  %v273_v32 = vmul.f32 %v209_v17, %v145_v21  ;;  %v393_v35 = vsel %vm282_vm1, %v271_v45, 0.0  ;;  %v150_v40 = vmax.f32 %v86_v18, 1e-06 }
  0x4b   :  { %v212_v34 = vmul.f32 %v148_v27, %v148_v27  ;;  %v341_v39 = vadd.f32 %v340_v31, %v339_v24  ;;  %v249_v62 = vmul.f32 %v185_v58, %v798_v1  ;;  %v274_v49 = vmul.f32 %v210_v23, %v146_v55 }
  0x4c   :  { %v392_v50 = vadd.f32 %v391_v46, %v390_v26  ;;  %v342_v33 = vsel %vm282_vm1, %v248_v48, 0.0  ;;  %v395_v47 = vsel %vm282_vm1, %v272_v53, 0.0  ;;  %v151_v54 = vmax.f32 %v87_v57, 1e-06 }
  0x4d   :  { %v213_v22 = vmul.f32 %v149_v28, %v149_v28  ;;  %v275_v25 = vmul.f32 %v211_v2, %v147_v36  ;;  %v397_v0 = vsel %vm282_vm1, %v273_v32, 0.0  ;;  %v152_v41 = vmax.f32 %v88_v59, 1e-06 }
  0x4e   :  { %v394_v52 = vadd.f32 %v393_v35, %v392_v50  ;;  %v343_v61 = vadd.f32 %v342_v33, %v341_v39  ;;  %v214_v51 = vmul.f32 %v150_v40, %v150_v40  ;;  %v276_v1 = vmul.f32 %v212_v34, %v148_v27 }
  0x4f   :  { %v344_v7 = vsel %vm282_vm1, %v249_v62, 0.0  ;;  %v399_v8 = vsel %vm282_vm1, %v274_v49, 0.0  ;;  %v153_v21 = vmax.f32 %v89_v29, 1e-06  ;;  %v215_v55 = vmul.f32 %v151_v54, %v151_v54  ;;  %v539_v49 = vld [vmem:[%s1053_s3] ss:$0 sm:$0xff] }
  0x50   :  { %v396_v44 = vadd.f32 %v395_v47, %v394_v52  ;;  %v277_v14 = vmul.f32 %v213_v22, %v149_v28  ;;  %v401_v19 = vsel %vm282_vm1, %v275_v25, 0.0  ;;  %v345_v37 = vadd.f32 %v344_v7, %v343_v61  ;;  %v25_v28 = vld [vmem:[#allocation2] sm:$0x3] }
  0x51   :  { %v216_v63 = vmul.f32 %v152_v41, %v152_v41  ;;  %v278_v5 = vmul.f32 %v214_v51, %v150_v40  ;;  %v403_v10 = vsel %vm282_vm1, %v276_v1, 0.0  ;;  %v217_v4 = vmul.f32 %v153_v21, %v153_v21 }
  0x52   :  { %v398_v9 = vadd.f32 %v397_v0, %v396_v44  ;;  %v279_v11 = vmul.f32 %v215_v55, %v151_v54  ;;  %v405_v60 = vsel %vm282_vm1, %v277_v14, 0.0  ;;  %v346_v43 = vrot.slane %v345_v37, 4 }
  0x53   :  { %v280_v20 = vmul.f32 %v216_v63, %v152_v41  ;;  %v407_v6 = vsel %vm282_vm1, %v278_v5, 0.0  ;;  %v281_v36 = vmul.f32 %v217_v4, %v153_v21  ;;  %vm423_vm4 = vcmask 1041409  }
  0x54   :  { %v400_v42 = vadd.f32 %v399_v8, %v398_v9  ;;  %v409_v38 = vsel %vm282_vm1, %v279_v11, 0.0  ;;  %v347_v13 = vadd.f32 %v346_v43, %v345_v37 }
  0x55   :  { %v411_v17 = vsel %vm282_vm1, %v280_v20, 0.0  ;;  %v413_v16 = vsel %vm282_vm1, %v281_v36, 0.0 }
  0x56   :  { %v402_v56 = vadd.f32 %v401_v19, %v400_v42  ;;  %v348_v12 = vrot.slane %v347_v13, 2 }
  0x58   :  { %v404_v15 = vadd.f32 %v403_v10, %v402_v56  ;;  %v349_v24 = vadd.f32 %v348_v12, %v347_v13 }
  0x5a   :  { %v406_v3 = vadd.f32 %v405_v60, %v404_v15  ;;  %v350_v48 = vrot.slane %v349_v24, 1 }
  0x5c   :  { %v408_v27 = vadd.f32 %v407_v6, %v406_v3  ;;  %v351_v46 = vadd.f32 %v350_v48, %v349_v24 }
  0x5e   :  { %v410_v45 = vadd.f32 %v409_v38, %v408_v27 }
  0x60   :  { %v412_v58 = vadd.f32 %v411_v17, %v410_v45 }
  0x62   :  { %v414_v23 = vadd.f32 %v413_v16, %v412_v58 }
  0x64   :  { %v415_v30 = vrot.slane %v414_v23, 4 }
  0x66   :  { %v416_v18 = vadd.f32 %v415_v30, %v414_v23 }
  0x68   :  { %v417_v53 = vrot.slane %v416_v18, 2 }
  0x6a   :  { %v418_v31 = vadd.f32 %v417_v53, %v416_v18 }
  0x6c   :  { %v419_v26 = vrot.slane %v418_v31, 1 }
  0x6e   :  { %v420_v2 = vadd.f32 %v419_v26, %v418_v31 }
  0x70   :  { %v424_v32 = vsel %vm423_vm4, %v420_v2, %v351_v46 }
  0x71   :  { %v426_v35 = vadd.f32 %v424_v32, %v25_v28 }
  0x73   :  { %428 = vst.msk [vmem:[#allocation2] sm:$0x3] %vm23_vm0, %v426_v35 }
  0x7a   :  { %v432_v57 = vld [vmem:[#allocation2] sm:$0x3] }
  0x7b   :  { %v433_v40 = vmul.f32 0.00390625, %v432_v57 }
  0x7d   :  { %552 = vlog2.f32 %v433_v40 }
  0x87   :  { %v553_v34 = vpop.eup %552 }
  0x88   :  { %v435_v39 = vmul.f32 0.6931472, %v553_v34 }
  0x8a   :  { %v436_v50 = vmul.f32 0.33333334, %v435_v39 }
  0x8c   :  { %v437_v59 = vmul.f32 1.442695, %v436_v50 }
  0x8e   :  { %554 = vpow2.f32 %v437_v59 }
  0x98   :  { %v555_v62 = vpop.eup %554 }
  0x99   :  { %547 = vmatmul.mubr.msk.f32.vlgmr.msra.gmra.mrb[0].mxu0 %vm282_vm1, %v555_v62 }
 0x16c   :  { %v520_v33 = vpop.f32.mrb[0].mxu0 }
 0x16d   :  { %v521_v47 = vadd.f32 %v539_v49, %v520_v33  ;;  %v548_v52 = vpop.f32.mrb[1].mxu0 }
 0x16f   :  { %524 = vst [vmem:[#allocation4] sm:$0x3] %v521_v47 }
 0x170   :  { %567 = shalt.err (!%p564_p4)
}
 0x171   :  { %s568_s14 = scalar_lea.hbm %s1054_s4, 32 }
 0x172   :  { %p569_p5 = scmp.ne.s32.totalorder %s1054_s4, %s568_s14  ;;  %p572_p6 = scmp.lt.u32.totalorder %s568_s14, %s1054_s4 }
 0x174   :  { %p574_p7 = pnand %p572_p6, %p569_p5 }
 0x176   :  { %577 = shalt.err (!%p574_p7)
}
 0x177   :  { %534 = dma.vmem_to_hbm [thread:$0]  %s532_s10, 32, %s1054_s4, [#allocation5]  }
 0x178   :  { %578 = dma.done.wait [#allocation5], 32  }
 0x179   :  { %579 = vsyncadd [#allocation5], 4294967264 }
 0x17a   :  { %538 = vsyncpa [#allocation5], 1 }

</bundles_post_ra>
